<compile_context>
chip_gen: v6e
topology: v6e:2x2x1
jax: 0.10.0
libtpu: 0.0.40
codegen_flags: <defaults>
</compile_context>

<pallas_src>
import jax
import jax.numpy as jnp
from jax.experimental import pallas as pl
from jax.experimental.pallas import tpu as pltpu


# ----------------------------------------------------------------------------
# Path 1 (preferred): zero-DMA aliased identity.
# ----------------------------------------------------------------------------
def _alias_touch_kernel(x_ref, o_ref):
    # Output aliases the input HBM buffer, so the bytes are already in place.
    # pltpu.touch marks the aliased output as produced without moving data.
    pltpu.touch(o_ref)


def _identity_aliased(x):
    return pl.pallas_call(
        _alias_touch_kernel,
        out_shape=jax.ShapeDtypeStruct(x.shape, x.dtype),
        in_specs=[pl.BlockSpec(memory_space=pl.ANY)],
        out_specs=pl.BlockSpec(memory_space=pl.ANY),
        input_output_aliases={0: 0},
        compiler_params=pltpu.CompilerParams(has_side_effects=True),
    )(x)


# ----------------------------------------------------------------------------
# Path 2 (fallback): lane-dense tiled HBM<->VMEM copy.
# ----------------------------------------------------------------------------
_LANE = 128
_TARGET_TILE_BYTES = 4 * 1024 * 1024   # 4 MiB tile; in+out double-buffered = 16 MiB live
_MIN_GRID_STEPS = 8                    # >= 4 steps per TensorCore on v7x for DMA overlap


def _copy_kernel(x_ref, o_ref):
    o_ref[...] = x_ref[...]


def _identity_copy(x):
    orig_shape = x.shape
    n = x.size
    if n == 0:
        return x

    # Widest multiple-of-128 width that exactly divides n (lane-dense, no pad).
    width = None
    for cand in (4096, 2048, 1024, 512, 256, 128):
        if n % cand == 0:
            width = cand
            break
    if width is None:
        # Ragged size: forward is the identity, so skip the copy rather than
        # paying pad + slice passes over HBM (review recommendation).
        return x

    rows = n // width
    itemsize = jnp.dtype(x.dtype).itemsize
    sublane = max(8, 32 // itemsize)   # 8 for f32, 16 for bf16, 32 for int8

    # Row tile from the byte budget, sublane-aligned.
    row_tile = max(sublane,
                   (_TARGET_TILE_BYTES // (width * itemsize)) // sublane * sublane)
    # Keep >= _MIN_GRID_STEPS grid steps when the input is big enough so both
    # v7x TensorCores get several steps each and in/out DMAs pipeline.
    if rows >= _MIN_GRID_STEPS * sublane:
        cap = max(sublane, (rows // _MIN_GRID_STEPS) // sublane * sublane)
        row_tile = min(row_tile, cap)
    row_tile = min(row_tile, rows)     # tiny inputs: single full-extent block

    x2d = x.reshape(rows, width)
    grid_rows = pl.cdiv(rows, row_tile)   # ragged final block masked by Pallas

    out2d = pl.pallas_call(
        _copy_kernel,
        out_shape=jax.ShapeDtypeStruct((rows, width), x.dtype),
        grid_spec=pltpu.PrefetchScalarGridSpec(
            num_scalar_prefetch=0,
            grid=(grid_rows,),
            in_specs=[pl.BlockSpec((row_tile, width), lambda i: (i, 0))],
            out_specs=pl.BlockSpec((row_tile, width), lambda i: (i, 0)),
        ),
        compiler_params=pltpu.CompilerParams(
            dimension_semantics=("parallel",),
            vmem_limit_bytes=32 * 1024 * 1024,   # headroom on v5e's 16 MiB default
        ),
    )(x2d)

    return out2d.reshape(orig_shape)


# ----------------------------------------------------------------------------
# Public wrapper: nnBase.forward
# ----------------------------------------------------------------------------
def nnbase_forward(x, **kwargs):
    """Pallas equivalent of nnBase.forward(x) -> x (kwargs ignored, as in torch)."""
    if x.size == 0:
        return x
    try:
        return _identity_aliased(x)
    except Exception:
        # Fall back to the tiled copy kernel if the ANY/touch form does not
        # lower on this jax/libtpu combination.
        return _identity_copy(x)


if __name__ == "__main__":
    # nnBase has no parameters; nothing to initialize.  Deterministic example
    # input consistent with the NCHW conv-style tensors its subclasses consume.
    key = jax.random.PRNGKey(0)
    x = jax.random.normal(key, (2, 4, 16, 16), dtype=jnp.float32)

    y = jax.block_until_ready(nnbase_forward(x))
    assert y.shape == x.shape
    assert y.dtype == x.dtype
    assert bool(jnp.all(y == x))

    # Exercise the tiled-copy fallback path explicitly as well.
    y2 = jax.block_until_ready(_identity_copy(x))
    assert bool(jnp.all(y2 == x))

    # Arbitrary-rank / non-128-divisible sizes are handled without padding.
    x3 = jax.random.normal(jax.random.PRNGKey(0), (2, 3, 5, 7), dtype=jnp.float32)
    y3 = jax.block_until_ready(nnbase_forward(x3))
    assert bool(jnp.all(y3 == x3))

    print("KERNEL_OK")
</pallas_src>

<mosaic_0001>
module attributes {stable_mosaic.version = 11 : i64} {
  func.func @_alias_touch_kernel(%arg0: memref<2x4x16x16xf32, #tpu.memory_space<any>>, %arg1: memref<2x4x16x16xf32, #tpu.memory_space<any>>) attributes {dimension_semantics = [], scalar_prefetch = 0 : i64, scratch_operands = 0 : i64, tpu.core_type = #tpu.core_type<tc>} {
    return
  }
}

module attributes {stable_mosaic.version = 11 : i64} {
  func.func @_copy_kernel(%arg0: i32, %arg1: memref<1x2048xf32, #tpu.memory_space<vmem>>, %arg2: memref<1x2048xf32, #tpu.memory_space<vmem>>) attributes {dimension_semantics = [#tpu.dimension_semantics<parallel>], iteration_bounds = array<i64: 1>, scalar_prefetch = 0 : i64, scratch_operands = 0 : i64, tpu.core_type = #tpu.core_type<tc>, window_params = [{transform_indices = @transform_0, window_bounds = array<i64: 1, 2048>}, {transform_indices = @transform_1, window_bounds = array<i64: 1, 2048>}]} {
    %c0 = arith.constant 0 : index
    %c0_0 = arith.constant 0 : index
    %0 = vector.load %arg1[%c0, %c0_0] : memref<1x2048xf32, #tpu.memory_space<vmem>>, vector<1x2048xf32>
    %c0_1 = arith.constant 0 : index
    %c0_2 = arith.constant 0 : index
    %1 = vector.load %arg2[%c0_1, %c0_2] : memref<1x2048xf32, #tpu.memory_space<vmem>>, vector<1x2048xf32>
    tpu.vector_store %arg2[%c0_1, %c0_2], %0 {strides = array<i32>} : memref<1x2048xf32, #tpu.memory_space<vmem>>, vector<1x2048xf32>,
    return
  }
  func.func @transform_0(%arg0: i32) -> (i32, i32) {
    %c0_i32 = arith.constant 0 : i32
    %c0_i32_0 = arith.constant 0 : i32
    return %arg0, %c0_i32 : i32, i32
  }
  func.func @transform_1(%arg0: i32) -> (i32, i32) {
    %c0_i32 = arith.constant 0 : i32
    %c0_i32_0 = arith.constant 0 : i32
    return %arg0, %c0_i32 : i32, i32
  }
}

</mosaic_0001>

<bundles_post_ra>
// kernel: tpu_custom_call.1
= control target key start
LH: loop header
LB: loop body
LE: loop exit
PB: predicated region body
PF: predicated region fallthrough
CT: control target
= control target key end

     0   :  { %s16_s0 = inlined_call_operand.hbm [shape: f32[2,4,16,16], index: 0, kind: input, shape index: {}, may-alias: {0,1}]   ;;  %s17_s1 = inlined_call_operand.hbm [shape: f32[2,4,16,16], index: 1, kind: output, shape index: {}, may-alias: {0,1}]  }

// kernel: tpu_custom_call.1
= control target key start
LH: loop header
LB: loop body
LE: loop exit
PB: predicated region body
PF: predicated region fallthrough
CT: control target
= control target key end

     0   :  { %6 = vsyncpa [#allocation3], 0  ;;  %s104_s0 = inlined_call_operand.hbm [shape: f32[1,2048], index: 0, kind: input, shape index: {}]   ;;  %s105_s1 = inlined_call_operand.hbm [shape: f32[1,2048], index: 1, kind: output, shape index: {}]  }
   0x1   :  { %7 = vsyncpa [#allocation4], 0  ;;  %s86_s6 = smov [#allocation2]  }
   0x2   :  { %s14_s7 = sshll.u32 %s86_s6, 4  ;;  %s15_s7 = int_to_ptr.vmem [resolvable:$true] %s14_s7 }
   0x3   :  { %s50_s8 = scalar_lea.vmem %s15_s7, 256  ;;  %p55_p1 = scmp.lt.s32.totalorder %s15_s7, %s15_s7 }
   0x4   :  { %p51_p0 = scmp.ne.s32.totalorder %s15_s7, %s50_s8  ;;  %p56_p2 = scmp.lt.s32.totalorder %s50_s8, %s50_s8 }
   0x6   :  { %p57_p3 = por %p56_p2, %p55_p1 }
   0x8   :  { %p58_p4 = pnand %p57_p3, %p51_p0 }
   0xa   :  { %61 = shalt.err (!%p58_p4)
}
   0xb   :  { %17 = dma.hbm_to_vmem [thread:$0]  %s104_s0, 256, %s15_s7, [#allocation3]  }
   0xc   :  { %82 = dma.done.wait [#allocation3], 256  }
   0xd   :  { %83 = vsyncadd [#allocation3], 4294967040  ;;  %s87_s11 = smov [#allocation5]   ;;  %v21_v0 = vld [vmem:[#allocation2] sm:$0xff]  ;;  %v22_v1 = vld [vmem:[#allocation2 + $0x8] sm:$0xff] }
   0xe   :  { %s31_s12 = sshll.u32 %s87_s11, 4  ;;  %23 = vst [vmem:[#allocation5] sm:$0xff] %v21_v0  ;;  %24 = vst [vmem:[#allocation5 + $0x8] sm:$0xff] %v22_v1  ;;  %s32_s12 = int_to_ptr.vmem [resolvable:$true] %s31_s12 }
   0xf   :  { %s62_s13 = scalar_lea.vmem %s32_s12, 256  ;;  %p67_p6 = scmp.lt.s32.totalorder %s32_s12, %s32_s12 }
  0x10   :  { %p63_p5 = scmp.ne.s32.totalorder %s32_s12, %s62_s13  ;;  %p68_p7 = scmp.lt.s32.totalorder %s62_s13, %s62_s13 }
  0x12   :  { %p69_p8 = por %p68_p7, %p67_p6 }
  0x14   :  { %p70_p9 = pnand %p69_p8, %p63_p5 }
  0x16   :  { %73 = shalt.err (!%p70_p9)
}
  0x17   :  { %34 = dma.vmem_to_hbm [thread:$0]  %s32_s12, 256, %s105_s1, [#allocation4]  }
  0x18   :  { %84 = dma.done.wait [#allocation4], 256  }
  0x19   :  { %85 = vsyncadd [#allocation4], 4294967040 }
  0x1a   :  { %38 = vsyncpa [#allocation3], 1 }
  0x1b   :  { %39 = vsyncpa [#allocation4], 1 }

</bundles_post_ra>
